<compile_context>
chip_gen: v6e
topology: v6e:2x2x1
jax: 0.10.0
libtpu: 0.0.40
codegen_flags: <defaults>
</compile_context>

<pallas_src>
import jax
import jax.numpy as jnp
from jax.experimental import pallas as pl
from jax.experimental.pallas import tpu as pltpu

# Padded, lane-aligned MLP dimensions.
F_PAD = 128    # real feature dim 59
H1_PAD = 256   # real hidden1 200
H2_PAD = 128   # real hidden2 100
OUT_PAD = 128  # real output width 1 (column 0)


def _round_up(x, m):
    return (x + m - 1) // m * m


def _mlp_kernel(x_ref, w1_ref, b1_ref, w2_ref, b2_ref, w3_ref, b3_ref, o_ref):
    # x: (TB, F_PAD) bf16; wK: (in, out) bf16; bK: (1, out) f32; o: (TB, OUT_PAD) f32.
    x = x_ref[...]
    h1 = jnp.dot(x, w1_ref[...], preferred_element_type=jnp.float32) + b1_ref[...]
    h1 = jnp.maximum(h1, 0.0)                                     # ReLU (f32, VPU)
    h2 = jnp.dot(h1.astype(jnp.bfloat16), w2_ref[...],
                 preferred_element_type=jnp.float32) + b2_ref[...]
    h2 = jnp.maximum(h2, 0.0)                                     # ReLU (f32, VPU)
    logits = jnp.dot(h2.astype(jnp.bfloat16), w3_ref[...],
                     preferred_element_type=jnp.float32) + b3_ref[...]
    o_ref[...] = 6.0 * jax.nn.sigmoid(logits)                     # 6 * Sigmoid (EUP)


def rating_predictor_forward(users, genders, ages, movies, genres, params,
                             *, block_b: int = 512):
    """Forward pass. Embedding gather + padded concat in JAX, MLP in Pallas."""
    ue = jnp.take(params["user_emb"], users, axis=0)               # (B, user_emb_dim)
    me = jnp.take(params["movie_emb"], movies, axis=0)             # (B, movie_emb_dim)
    x = jnp.concatenate(
        [ue, genders.astype(jnp.float32), ages.astype(jnp.float32),
         me, genres.astype(jnp.float32)], axis=1)                  # (B, F) f32
    B, F = x.shape

    # Batch tiling: TB rows per grid step (multiple of 8 sublanes), pad B up to it.
    tb = min(block_b, _round_up(B, 8))
    b_pad = _round_up(B, tb)
    x = jnp.pad(x, ((0, b_pad - B), (0, F_PAD - F))).astype(jnp.bfloat16)

    grid = (b_pad // tb,)
    resident = lambda i: (0, 0)   # weights/biases: same block every step -> VMEM-resident

    flops = 2 * b_pad * (F_PAD * H1_PAD + H1_PAD * H2_PAD + H2_PAD * OUT_PAD)
    bytes_accessed = (
        x.size * 2 + b_pad * OUT_PAD * 4
        + (params["w1"].size + params["w2"].size + params["w3"].size) * 2
        + (params["b1"].size + params["b2"].size + params["b3"].size) * 4)

    out = pl.pallas_call(
        _mlp_kernel,
        out_shape=jax.ShapeDtypeStruct((b_pad, OUT_PAD), jnp.float32),
        grid=grid,
        in_specs=[
            pl.BlockSpec((tb, F_PAD), lambda i: (i, 0)),        # x tile (pipelined)
            pl.BlockSpec((F_PAD, H1_PAD), resident),            # w1
            pl.BlockSpec((1, H1_PAD), resident),                # b1
            pl.BlockSpec((H1_PAD, H2_PAD), resident),           # w2
            pl.BlockSpec((1, H2_PAD), resident),                # b2
            pl.BlockSpec((H2_PAD, OUT_PAD), resident),          # w3 (only col 0 nonzero)
            pl.BlockSpec((1, OUT_PAD), resident),               # b3
        ],
        out_specs=pl.BlockSpec((tb, OUT_PAD), lambda i: (i, 0)),  # lane-dense out slab
        compiler_params=pltpu.CompilerParams(
            dimension_semantics=("parallel",)),                   # megacore on v7x
        cost_estimate=pl.CostEstimate(
            flops=flops, transcendentals=b_pad * OUT_PAD,
            bytes_accessed=bytes_accessed),
    )(
        x,
        params["w1"], params["b1"],
        params["w2"], params["b2"],
        params["w3"], params["b3"],
    )
    # Strip batch padding and the 127 padding lanes (real rating lives in column 0).
    return out[:B, 0:1]


def init_params(key, n_users, n_genders, n_ages, n_movies,
                user_emb_dim, movie_emb_dim, n_genres):
    """Synthetic params, zero-padded to lane-aligned shapes; weights stored bf16."""
    in_dim = user_emb_dim + n_genders + n_ages + movie_emb_dim + n_genres
    assert in_dim <= F_PAD
    ks = jax.random.split(key, 8)

    def unif(k, shape, scale):
        return jax.random.uniform(k, shape, jnp.float32, -scale, scale)

    def pad2(a, rows, cols):
        return jnp.pad(a, ((0, rows - a.shape[0]), (0, cols - a.shape[1])))

    w1 = pad2(unif(ks[2], (in_dim, 200), 1.0 / jnp.sqrt(in_dim)), F_PAD, H1_PAD)
    b1 = pad2(unif(ks[3], (1, 200), 1.0 / jnp.sqrt(in_dim)), 1, H1_PAD)
    w2 = pad2(unif(ks[4], (200, 100), 1.0 / jnp.sqrt(200.0)), H1_PAD, H2_PAD)
    b2 = pad2(unif(ks[5], (1, 100), 1.0 / jnp.sqrt(200.0)), 1, H2_PAD)
    w3 = pad2(unif(ks[6], (100, 1), 1.0 / jnp.sqrt(100.0)), H2_PAD, OUT_PAD)
    b3 = pad2(unif(ks[7], (1, 1), 1.0 / jnp.sqrt(100.0)), 1, OUT_PAD)

    return {
        "user_emb": jax.random.normal(ks[0], (n_users, user_emb_dim), jnp.float32),
        "movie_emb": jax.random.normal(ks[1], (n_movies, movie_emb_dim), jnp.float32),
        # bf16 MXU inputs (f32 accumulation in-kernel); biases stay f32.
        "w1": w1.astype(jnp.bfloat16), "b1": b1,
        "w2": w2.astype(jnp.bfloat16), "b2": b2,
        "w3": w3.astype(jnp.bfloat16), "b3": b3,
    }


if __name__ == "__main__":
    # Small, forward-consistent shapes.
    n_users, n_movies = 50, 100
    user_emb_dim, movie_emb_dim = 16, 16
    n_genders, n_ages, n_genres = 2, 7, 18
    B = 8

    key = jax.random.PRNGKey(0)
    kp, ku, km, kg, ka, kr = jax.random.split(key, 6)

    params = init_params(kp, n_users, n_genders, n_ages, n_movies,
                         user_emb_dim, movie_emb_dim, n_genres)

    users = jax.random.randint(ku, (B,), 0, n_users, jnp.int32)
    movies = jax.random.randint(km, (B,), 0, n_movies, jnp.int32)
    genders = jax.nn.one_hot(
        jax.random.randint(kg, (B,), 0, n_genders), n_genders, dtype=jnp.float32)
    ages = jax.nn.one_hot(
        jax.random.randint(ka, (B,), 0, n_ages), n_ages, dtype=jnp.float32)
    genres = (jax.random.uniform(kr, (B, n_genres)) < 0.2).astype(jnp.float32)

    fwd = jax.jit(rating_predictor_forward)
    out = jax.block_until_ready(fwd(users, genders, ages, movies, genres, params))
    assert out.shape == (B, 1)

    # Pure-JAX reference mirroring the kernel math (bf16 MXU inputs, f32 accumulate).
    ue = jnp.take(params["user_emb"], users, axis=0)
    me = jnp.take(params["movie_emb"], movies, axis=0)
    xr = jnp.concatenate([ue, genders, ages, me, genres], axis=1)
    F = xr.shape[1]
    xr = jnp.pad(xr, ((0, 0), (0, F_PAD - F))).astype(jnp.bfloat16)
    h1 = jnp.maximum(
        jnp.dot(xr, params["w1"], preferred_element_type=jnp.float32) + params["b1"], 0.0)
    h2 = jnp.maximum(
        jnp.dot(h1.astype(jnp.bfloat16), params["w2"],
                preferred_element_type=jnp.float32) + params["b2"], 0.0)
    ref = 6.0 * jax.nn.sigmoid(
        jnp.dot(h2.astype(jnp.bfloat16), params["w3"],
                preferred_element_type=jnp.float32) + params["b3"])
    ref = ref[:, 0:1]

    assert jnp.allclose(out, ref, atol=1e-4, rtol=1e-4), (out, ref)

    print("KERNEL_OK")
</pallas_src>

<mosaic_0001>
module attributes {stable_mosaic.version = 11 : i64} {
  func.func @_mlp_kernel(%arg0: i32, %arg1: memref<8x128xbf16, #tpu.memory_space<vmem>>, %arg2: memref<128x256xbf16, #tpu.memory_space<vmem>>, %arg3: memref<1x256xf32, #tpu.memory_space<vmem>>, %arg4: memref<256x128xbf16, #tpu.memory_space<vmem>>, %arg5: memref<1x128xf32, #tpu.memory_space<vmem>>, %arg6: memref<128x128xbf16, #tpu.memory_space<vmem>>, %arg7: memref<1x128xf32, #tpu.memory_space<vmem>>, %arg8: memref<8x128xf32, #tpu.memory_space<vmem>>) attributes {dimension_semantics = [#tpu.dimension_semantics<parallel>], iteration_bounds = array<i64: 1>, scalar_prefetch = 0 : i64, scratch_operands = 0 : i64, tpu.core_type = #tpu.core_type<tc>, window_params = [{transform_indices = @transform_0, window_bounds = array<i64: 8, 128>}, {pipeline_mode = #tpu.pipeline_mode<synchronous>, transform_indices = @transform_1, window_bounds = array<i64: 128, 256>}, {pipeline_mode = #tpu.pipeline_mode<synchronous>, transform_indices = @transform_2, window_bounds = array<i64: 1, 256>}, {pipeline_mode = #tpu.pipeline_mode<synchronous>, transform_indices = @transform_3, window_bounds = array<i64: 256, 128>}, {pipeline_mode = #tpu.pipeline_mode<synchronous>, transform_indices = @transform_4, window_bounds = array<i64: 1, 128>}, {pipeline_mode = #tpu.pipeline_mode<synchronous>, transform_indices = @transform_5, window_bounds = array<i64: 128, 128>}, {pipeline_mode = #tpu.pipeline_mode<synchronous>, transform_indices = @transform_6, window_bounds = array<i64: 1, 128>}, {transform_indices = @transform_7, window_bounds = array<i64: 8, 128>}]} {
    %c0 = arith.constant 0 : index
    %c0_0 = arith.constant 0 : index
    %0 = vector.load %arg1[%c0, %c0_0] : memref<8x128xbf16, #tpu.memory_space<vmem>>, vector<8x128xbf16>
    %c0_1 = arith.constant 0 : index
    %c0_2 = arith.constant 0 : index
    %1 = vector.load %arg2[%c0_1, %c0_2] : memref<128x256xbf16, #tpu.memory_space<vmem>>, vector<128x256xbf16>
    %cst = arith.constant dense<0.000000e+00> : vector<8x256xf32>
    %2 = tpu.matmul %0, %1, %cst {dimension_numbers = #tpu.dot_dimension_numbers<[1], [0], [0], [1], [0, 0, 1, 1], [], []>} : vector<8x128xbf16>, vector<128x256xbf16>, vector<8x256xf32> -> vector<8x256xf32>
    %c0_3 = arith.constant 0 : index
    %c0_4 = arith.constant 0 : index
    %3 = vector.load %arg3[%c0_3, %c0_4] : memref<1x256xf32, #tpu.memory_space<vmem>>, vector<1x256xf32>
    %4 = vector.broadcast %3 : vector<1x256xf32> to vector<8x256xf32>
    %5 = arith.addf %2, %4 : vector<8x256xf32>
    %cst_5 = arith.constant 0.000000e+00 : f32
    %6 = vector.broadcast %cst_5 : f32 to vector<8x256xf32>
    %7 = arith.maximumf %5, %6 : vector<8x256xf32>
    %8 = arith.truncf %7 : vector<8x256xf32> to vector<8x256xbf16>
    %c0_6 = arith.constant 0 : index
    %c0_7 = arith.constant 0 : index
    %9 = vector.load %arg4[%c0_6, %c0_7] : memref<256x128xbf16, #tpu.memory_space<vmem>>, vector<256x128xbf16>
    %cst_8 = arith.constant dense<0.000000e+00> : vector<8x128xf32>
    %10 = tpu.matmul %8, %9, %cst_8 {dimension_numbers = #tpu.dot_dimension_numbers<[1], [0], [0], [1], [0, 0, 1, 1], [], []>} : vector<8x256xbf16>, vector<256x128xbf16>, vector<8x128xf32> -> vector<8x128xf32>
    %c0_9 = arith.constant 0 : index
    %c0_10 = arith.constant 0 : index
    %11 = vector.load %arg5[%c0_9, %c0_10] : memref<1x128xf32, #tpu.memory_space<vmem>>, vector<1x128xf32>
    %12 = vector.broadcast %11 : vector<1x128xf32> to vector<8x128xf32>
    %13 = arith.addf %10, %12 : vector<8x128xf32>
    %cst_11 = arith.constant 0.000000e+00 : f32
    %14 = vector.broadcast %cst_11 : f32 to vector<8x128xf32>
    %15 = arith.maximumf %13, %14 : vector<8x128xf32>
    %16 = arith.truncf %15 : vector<8x128xf32> to vector<8x128xbf16>
    %c0_12 = arith.constant 0 : index
    %c0_13 = arith.constant 0 : index
    %17 = vector.load %arg6[%c0_12, %c0_13] : memref<128x128xbf16, #tpu.memory_space<vmem>>, vector<128x128xbf16>
    %cst_14 = arith.constant dense<0.000000e+00> : vector<8x128xf32>
    %18 = tpu.matmul %16, %17, %cst_14 {dimension_numbers = #tpu.dot_dimension_numbers<[1], [0], [0], [1], [0, 0, 1, 1], [], []>} : vector<8x128xbf16>, vector<128x128xbf16>, vector<8x128xf32> -> vector<8x128xf32>
    %c0_15 = arith.constant 0 : index
    %c0_16 = arith.constant 0 : index
    %19 = vector.load %arg7[%c0_15, %c0_16] : memref<1x128xf32, #tpu.memory_space<vmem>>, vector<1x128xf32>
    %20 = vector.broadcast %19 : vector<1x128xf32> to vector<8x128xf32>
    %21 = arith.addf %18, %20 : vector<8x128xf32>
    %22 = arith.negf %21 : vector<8x128xf32>
    %23 = math.exp %22 : vector<8x128xf32>
    %cst_17 = arith.constant 1.000000e+00 : f32
    %24 = vector.broadcast %cst_17 : f32 to vector<8x128xf32>
    %25 = arith.addf %24, %23 : vector<8x128xf32>
    %26 = arith.divf %24, %25 : vector<8x128xf32>
    %cst_18 = arith.constant 6.000000e+00 : f32
    %27 = vector.broadcast %cst_18 : f32 to vector<8x128xf32>
    %28 = arith.mulf %27, %26 : vector<8x128xf32>
    %c0_19 = arith.constant 0 : index
    %c0_20 = arith.constant 0 : index
    %29 = vector.load %arg8[%c0_19, %c0_20] : memref<8x128xf32, #tpu.memory_space<vmem>>, vector<8x128xf32>
    tpu.vector_store %arg8[%c0_19, %c0_20], %28 {strides = array<i32>} : memref<8x128xf32, #tpu.memory_space<vmem>>, vector<8x128xf32>,
    return
  }
  func.func @transform_0(%arg0: i32) -> (i32, i32) {
    %c0_i32 = arith.constant 0 : i32
    %c0_i32_0 = arith.constant 0 : i32
    return %arg0, %c0_i32 : i32, i32
  }
  func.func @transform_1(%arg0: i32) -> (i32, i32) {
    %c0_i32 = arith.constant 0 : i32
    %c0_i32_0 = arith.constant 0 : i32
    %c0_i32_1 = arith.constant 0 : i32
    return %c0_i32, %c0_i32_0 : i32, i32
  }
  func.func @transform_2(%arg0: i32) -> (i32, i32) {
    %c0_i32 = arith.constant 0 : i32
    %c0_i32_0 = arith.constant 0 : i32
    %c0_i32_1 = arith.constant 0 : i32
    return %c0_i32, %c0_i32_0 : i32, i32
  }
  func.func @transform_3(%arg0: i32) -> (i32, i32) {
    %c0_i32 = arith.constant 0 : i32
    %c0_i32_0 = arith.constant 0 : i32
    %c0_i32_1 = arith.constant 0 : i32
    return %c0_i32, %c0_i32_0 : i32, i32
  }
  func.func @transform_4(%arg0: i32) -> (i32, i32) {
    %c0_i32 = arith.constant 0 : i32
    %c0_i32_0 = arith.constant 0 : i32
    %c0_i32_1 = arith.constant 0 : i32
    return %c0_i32, %c0_i32_0 : i32, i32
  }
  func.func @transform_5(%arg0: i32) -> (i32, i32) {
    %c0_i32 = arith.constant 0 : i32
    %c0_i32_0 = arith.constant 0 : i32
    %c0_i32_1 = arith.constant 0 : i32
    return %c0_i32, %c0_i32_0 : i32, i32
  }
  func.func @transform_6(%arg0: i32) -> (i32, i32) {
    %c0_i32 = arith.constant 0 : i32
    %c0_i32_0 = arith.constant 0 : i32
    %c0_i32_1 = arith.constant 0 : i32
    return %c0_i32, %c0_i32_0 : i32, i32
  }
  func.func @transform_7(%arg0: i32) -> (i32, i32) {
    %c0_i32 = arith.constant 0 : i32
    %c0_i32_0 = arith.constant 0 : i32
    return %arg0, %c0_i32 : i32, i32
  }
}

</mosaic_0001>

<bundles_post_ra>
// kernel: rating_predictor_forward.1
= control target key start
LH: loop header
LB: loop body
LE: loop exit
PB: predicated region body
PF: predicated region fallthrough
CT: control target
= control target key end

     0   :  { %12 = vsyncpa [#allocation3], 0  ;;  %s670_s24 = smov [#allocation2]   ;;  %s830_s0 = inlined_call_operand.vmem [shape: bf16[8,128], index: 0, kind: input, shape index: {}]   ;;  %s831_s1 = inlined_call_operand.vmem [shape: bf16[128,256], index: 1, kind: input, shape index: {}]   ;;  %s832_s2 = inlined_call_operand.vmem [shape: f32[1,256], index: 2, kind: input, shape index: {}]   ;;  %s833_s3 = inlined_call_operand.vmem [shape: bf16[256,128], index: 3, kind: input, shape index: {}]   ;;  %s834_s4 = inlined_call_operand.vmem [shape: f32[1,128], index: 4, kind: input, shape index: {}]   ;;  %s835_s5 = inlined_call_operand.hbm [shape: bf16[128,128], index: 5, kind: input, shape index: {}]   ;;  %s836_s6 = inlined_call_operand.vmem [shape: f32[1,128], index: 6, kind: input, shape index: {}]   ;;  %s837_s7 = inlined_call_operand.vmem [shape: f32[8,128], index: 7, kind: output, shape index: {}]  }
   0x1   :  { %s28_s25 = sshll.u32 %s670_s24, 4  ;;  %s29_s25 = int_to_ptr.vmem [resolvable:$true] %s28_s25 }
   0x2   :  { %s656_s26 = scalar_lea.vmem %s29_s25, 1024  ;;  %p661_p1 = scmp.lt.s32.totalorder %s29_s25, %s29_s25 }
   0x3   :  { %p657_p0 = scmp.ne.s32.totalorder %s29_s25, %s656_s26  ;;  %p662_p2 = scmp.lt.s32.totalorder %s656_s26, %s656_s26 }
   0x5   :  { %p663_p3 = por %p662_p2, %p661_p1 }
   0x7   :  { %p664_p4 = pnand %p663_p3, %p657_p0 }
   0x9   :  { %667 = shalt.err (!%p664_p4)
}
   0xa   :  { %s671_s27 = smov 64   ;;  %s672_s28 = smov 4  }
   0xb   :  { %34 = dma.hbm_to_vmem [thread:$0]  %s835_s5, 1024, %s29_s25, [#allocation3], %s671_s27, %s671_s27, %s672_s28  }
   0xc   :  { %668 = dma.done.wait [#allocation3], 1024  }
   0xd   :  { %669 = vsyncadd [#allocation3], 4294966272  ;;  %v673_v0 = vmov 0   ;;  %v596_v1 = vld [vmem:[%s831_s1 + $0x74] ss:$8 sps:$4 sm:$0xff]   ;;  %v624_v15 = vld [vmem:[%s833_s3 + $0x68] sm:$0xff]   ;;  %v60_v40 = vlaneseq }
   0xe   :  { %182 = vmatprep.mubr.bf16.mxu0 %v673_v0  ;;  %v598_v2 = vld [vmem:[%s831_s1 + $0x70] ss:$8 sps:$4 sm:$0xff]   ;;  %150 = vmatprep.subr.bf16.mxu0 %v596_v1  ;;  %v599_v3 = vld [vmem:[%s831_s1 + $0x64] ss:$8 sps:$4 sm:$0xff]   ;;  %v601_v4 = vld [vmem:[%s831_s1 + $0x60] ss:$8 sps:$4 sm:$0xff]  }
   0xf   :  { %151 = vmatpush1.bf16.msra.mxu0 %v598_v2  ;;  %v602_v5 = vld [vmem:[%s831_s1 + $0x54] ss:$8 sps:$4 sm:$0xff]   ;;  %v604_v6 = vld [vmem:[%s831_s1 + $0x50] ss:$8 sps:$4 sm:$0xff]   ;;  %v605_v7 = vld [vmem:[%s831_s1 + $0x44] ss:$8 sps:$4 sm:$0xff]  }
  0x10   :  { %152 = vmatprep.subr.bf16.mxu0 %v599_v3  ;;  %v607_v8 = vld [vmem:[%s831_s1 + $0x40] ss:$8 sps:$4 sm:$0xff]   ;;  %v608_v9 = vld [vmem:[%s831_s1 + $0x34] ss:$8 sps:$4 sm:$0xff]   ;;  %v610_v12 = vld [vmem:[%s831_s1 + $0x30] ss:$8 sps:$4 sm:$0xff]  }
  0x11   :  { %v620_v10 = vld [vmem:[%s833_s3 + $0x78] sm:$0xff]   ;;  %v622_v13 = vld [vmem:[%s833_s3 + $0x70] sm:$0xff]   ;;  %v611_v16 = vld [vmem:[%s831_s1 + $0x24] ss:$8 sps:$4 sm:$0xff]   ;;  %v674_v35 = vmov 0.0   ;;  %v61_v41 = vshrl.u32 %v60_v40, 7 }
  0x12   :  { %v621_v11 = vld [vmem:[%s833_s3 + $0x38] sm:$0xff]   ;;  %539 = vmatprep.subr.bf16.mxu1 %v620_v10  ;;  %v623_v14 = vld [vmem:[%s833_s3 + $0x30] sm:$0xff]   ;;  %v613_v17 = vld [vmem:[%s831_s1 + $0x20] ss:$8 sps:$4 sm:$0xff]   ;;  %vm675_vm0 = vmmov 0  }
  0x13   :  { %153 = vmatpush1.bf16.msra.mxu0 %v601_v4  ;;  %540 = vmatpush3.bf16.msra.mxu1 %v621_v11  ;;  %v625_v18 = vld [vmem:[%s833_s3 + $0x28] sm:$0xff]   ;;  %v626_v19 = vld [vmem:[%s833_s3 + $0x60] sm:$0xff]   ;;  %v614_v20 = vld [vmem:[%s831_s1 + $0x14] ss:$8 sps:$4 sm:$0xff]   ;;  %v62_v42 = vsub.s32 0, %v61_v41  ;;  %v66_v44 = vsub.s32 1, %v61_v41 }
  0x14   :  { %154 = vmatprep.subr.bf16.mxu0 %v602_v5  ;;  %541 = vmatprep.subr.bf16.mxu1 %v622_v13  ;;  %v616_v21 = vld [vmem:[%s831_s1 + $0x10] ss:$8 sps:$4 sm:$0xff]   ;;  %v617_v22 = vld [vmem:[%s831_s1 + $0x4] ss:$8 sps:$4 sm:$0xff]   ;;  %v619_v26 = vld [vmem:[%s831_s1] ss:$8 sps:$4 sm:$0xff]  }
  0x15   :  { %v627_v23 = vld [vmem:[%s833_s3 + $0x20] sm:$0xff]   ;;  %v628_v24 = vld [vmem:[%s833_s3 + $0x58] sm:$0xff]   ;;  %v630_v27 = vld [vmem:[%s833_s3 + $0x50] sm:$0xff]  }
  0x16   :  { %v629_v25 = vld [vmem:[%s833_s3 + $0x18] sm:$0xff]   ;;  %v631_v28 = vld [vmem:[%s833_s3 + $0x10] sm:$0xff]   ;;  %v41_v29 = vld [vmem:[%s830_s0] sm:$0xf] }
  0x17   :  { %155 = vmatpush1.bf16.msra.mxu0 %v604_v6  ;;  %542 = vmatpush3.bf16.msra.mxu1 %v623_v14  ;;  %v632_v30 = vld [vmem:[%s833_s3 + $0x48] sm:$0xff]   ;;  %v634_v32 = vld [vmem:[%s833_s3 + $0x40] sm:$0xff]   ;;  %v636_v34 = vld [vmem:[#allocation2 + $0x38] sm:$0xff]  }
  0x18   :  { %156 = vmatprep.subr.bf16.mxu0 %v605_v7  ;;  %543 = vmatprep.subr.bf16.mxu1 %v624_v15  ;;  %v633_v31 = vld [vmem:[%s833_s3 + $0x8] sm:$0xff]   ;;  %v635_v33 = vld [vmem:[%s833_s3] sm:$0xff]   ;;  %v637_v36 = vld [vmem:[#allocation2 + $0x30] sm:$0xff]  }
  0x19   :  { %v638_v37 = vld [vmem:[#allocation2 + $0x28] sm:$0xff]   ;;  %v639_v38 = vld [vmem:[#allocation2 + $0x20] sm:$0xff]   ;;  %v640_v39 = vld [vmem:[#allocation2 + $0x18] sm:$0xff]  }
  0x1a   :  { %v58_v43 = vld [vmem:[%s832_s2] sm:$0x3]  ;;  %v641_v57 = vld [vmem:[#allocation2 + $0x10] sm:$0xff]   ;;  %v642_v58 = vld [vmem:[#allocation2 + $0x8] sm:$0xff]  }
  0x1b   :  { %157 = vmatpush1.bf16.msra.mxu0 %v607_v8  ;;  %544 = vmatpush3.bf16.msra.mxu1 %v625_v18  ;;  %v63_v45 = vrot.slane %v58_v43, %v62_v42  ;;  %v67_v46 = vrot.slane %v58_v43, %v66_v44  ;;  %v643_v59 = vld [vmem:[#allocation2] sm:$0xff]  }
  0x1c   :  { %158 = vmatprep.subr.bf16.mxu0 %v608_v9  ;;  %545 = vmatprep.subr.bf16.mxu1 %v626_v19  ;;  %v512_v61 = vld [vmem:[%s834_s4] ss:$0 sm:$0xff] }
  0x1d   :  { %v529_v5 = vld [vmem:[%s836_s6] ss:$0 sm:$0xff] }
  0x1f   :  { %159 = vmatpush1.bf16.msra.mxu0 %v610_v12  ;;  %546 = vmatpush3.bf16.msra.mxu1 %v627_v23 }
  0x20   :  { %160 = vmatprep.subr.bf16.mxu0 %v611_v16  ;;  %547 = vmatprep.subr.bf16.mxu1 %v628_v24 }
  0x23   :  { %161 = vmatpush1.bf16.msra.mxu0 %v613_v17  ;;  %548 = vmatpush3.bf16.msra.mxu1 %v629_v25 }
  0x24   :  { %162 = vmatprep.subr.bf16.mxu0 %v614_v20  ;;  %549 = vmatprep.subr.bf16.mxu1 %v630_v27 }
  0x27   :  { %163 = vmatpush1.bf16.msra.mxu0 %v616_v21  ;;  %550 = vmatpush3.bf16.msra.mxu1 %v631_v28 }
  0x28   :  { %164 = vmatprep.subr.bf16.mxu0 %v617_v22  ;;  %551 = vmatprep.subr.bf16.mxu1 %v632_v30 }
  0x2b   :  { %165 = vmatpush1.bf16.msra.mxu0 %v619_v26  ;;  %552 = vmatpush3.bf16.msra.mxu1 %v633_v31 }
  0x2c   :  { %553 = vmatprep.subr.bf16.mxu1 %v634_v32  ;;  %570 = vmatprep.subr.bf16.mxu0 %v674_v35 }
  0x2e   :  { %183 = vmatmul.mubr.bf16.vlgmr.msra.gmra.mxu0 %v41_v29 }
  0x2f   :  { %554 = vmatpush3.bf16.msra.mxu1 %v635_v33  ;;  %571 = vmatpush3.bf16.msra.mxu0 %v636_v34 }
  0x30   :  { %572 = vmatprep.subr.bf16.mxu0 %v674_v35  ;;  %586 = vmatprep.mubr.msk.bf16.mxu0 %vm675_vm0, %v674_v35 }
  0x33   :  { %573 = vmatpush3.bf16.msra.mxu0 %v637_v36 }
  0x34   :  { %574 = vmatprep.subr.bf16.mxu0 %v674_v35 }
  0x37   :  { %575 = vmatpush3.bf16.msra.mxu0 %v638_v37 }
  0x38   :  { %576 = vmatprep.subr.bf16.mxu0 %v674_v35 }
  0x3b   :  { %577 = vmatpush3.bf16.msra.mxu0 %v639_v38 }
  0x3c   :  { %578 = vmatprep.subr.bf16.mxu0 %v674_v35 }
  0x3f   :  { %579 = vmatpush3.bf16.msra.mxu0 %v640_v39 }
  0x40   :  { %580 = vmatprep.subr.bf16.mxu0 %v674_v35 }
  0x43   :  { %581 = vmatpush3.bf16.msra.mxu0 %v641_v57 }
  0x44   :  { %582 = vmatprep.subr.bf16.mxu0 %v674_v35 }
  0x47   :  { %583 = vmatpush3.bf16.msra.mxu0 %v642_v58 }
  0x48   :  { %584 = vmatprep.subr.bf16.mxu0 %v674_v35 }
  0x4b   :  { %585 = vmatpush3.bf16.msra.mxu0 %v643_v59 }
  0xee   :  { %v184_v47 = vpop.f32.mrf.mxu0 }
  0xef   :  { %v185_v48 = vadd.f32 %v184_v47, %v63_v45 }
  0xf0   :  { %v186_v49 = vpop.f32.mrf.mxu0 }
  0xf1   :  { %v187_v50 = vadd.f32 %v186_v49, %v67_v46  ;;  %v191_v51 = vmax.f32 %v185_v48, 0.0 }
  0xf2   :  { %v188_v52 = vpop.f32.mrf.mxu0 }
  0xf3   :  { %v192_v53 = vmax.f32 %v187_v50, 0.0  ;;  %v193_v56 = vpack.c.bf16 %v191_v51, %v191_v51 }
  0xf4   :  { %v189_v54 = vpop.f32.mrf.mxu0 }
  0xf5   :  { %v194_v55 = vpack.c.bf16 %v192_v53, %v192_v53 }
  0xf7   :  { %362 = vmatprep.mubr.bf16.mxu1 %v194_v55 }
  0xf8   :  { %363 = vmatmul.mubr.bf16.vlgmr.msra.gmra.mxu1 %v193_v56 }
 0x1b8   :  { %v555_v60 = vpop.f32.mrf.mxu1 }
 0x1ba   :  { %v556_v62 = vpop.f32.mrf.mxu1 }
 0x1bb   :  { %v557_v63 = vadd.f32 %v556_v62, %v555_v60 }
 0x1bc   :  { %v558_v0 = vpop.f32.mrf.mxu1 }
 0x1bd   :  { %v365_v1 = vadd.f32 %v557_v63, %v512_v61 }
 0x1be   :  { %v559_v2 = vpop.f32.mrf.mxu1 }
 0x1bf   :  { %v370_v3 = vmax.f32 %v365_v1, 0.0 }
 0x1c1   :  { %v371_v4 = vpack.c.bf16 %v370_v3, %v370_v3 }
 0x1c3   :  { %587 = vmatmul.mubr.bf16.vlgmr.msra.gmra.mxu0 %v371_v4 }
 0x283   :  { %v477_v6 = vpop.f32.mrf.mxu0 }
 0x284   :  { %v478_v7 = vadd.f32 %v529_v5, %v477_v6 }
 0x285   :  { %v588_v8 = vpop.f32.mrf.mxu0 }
 0x286   :  { %v538_v9 = vmul.f32 -1.442695, %v478_v7 }
 0x287   :  { %v480_v10 = vpop.f32.mrf.mxu0 }
 0x288   :  { %644 = vpow2.f32 %v538_v9 }
 0x289   :  { %v589_v11 = vpop.f32.mrf.mxu0 }
 0x295   :  { %v645_v12 = vpop.eup %644 }
 0x296   :  { %v486_v13 = vadd.f32 1.0, %v645_v12 }
 0x298   :  { %646 = vrcp.f32 %v486_v13 }
 0x2a5   :  { %v647_v14 = vpop.eup %646 }
 0x2a6   :  { %v489_v15 = vmul.f32 6.0, %v647_v14 }
 0x2a8   :  { %490 = vst [vmem:[%s837_s7] sm:$0xff] %v489_v15 }
 0x2a9   :  { %495 = vsyncpa [#allocation3], 1 }

</bundles_post_ra>
